<compile_context>
chip_gen: v5e
topology: v5e:2x2
jax: 0.10.0
libtpu: 0.0.40
codegen_flags: <defaults>
</compile_context>

<pallas_src>
import functools

import jax
import jax.numpy as jnp
from jax.experimental import pallas as pl
from jax.experimental.pallas import tpu as pltpu


def _round_up(x, m):
    return ((x + m - 1) // m) * m


def _pad_to(a, shape):
    pads = [(0, t - s) for s, t in zip(a.shape, shape)]
    if any(p[1] for p in pads):
        a = jnp.pad(a, pads)
    return a


def _fusion_kernel(n_layers, d_in, d_pad, eps, fuse_concat,
                   img_ref, pc_ref, *refs):
    # refs = (w0, b0, w1, b1, ..., w_{n-1}, b_{n-1}, gamma, beta, out_ref)
    out_ref = refs[-1]
    p_refs = refs[:-1]
    w0_ref, b0_ref = p_refs[0], p_refs[1]
    gamma = p_refs[-2][...].astype(jnp.float32)
    beta = p_refs[-1][...].astype(jnp.float32)

    cdt = w0_ref.dtype
    img = img_ref[...].astype(cdt)     # cast on the VPU, hidden under the MXU
    pc = pc_ref[...].astype(cdt)

    # Layer 0: the concat never touches HBM.  When D is lane-aligned the
    # concat happens in-register and feeds a single K=2D MXU pass; otherwise
    # the stacked first weight is sliced and two K=D passes accumulate in f32.
    if fuse_concat:
        x0 = jnp.concatenate([img, pc], axis=-1)
        h = jnp.dot(x0, w0_ref[...], preferred_element_type=jnp.float32)
    else:
        h = (jnp.dot(img, w0_ref[:d_in, :], preferred_element_type=jnp.float32)
             + jnp.dot(pc, w0_ref[d_in:, :], preferred_element_type=jnp.float32))
    h = h + b0_ref[...].astype(jnp.float32)
    if n_layers > 1:
        h = jnp.maximum(h, 0.0)
        # TODO(synk): dropout (p=0.0 / eval) is identity; a train-mode version
        # would use pltpu.prng_seed + pltpu.prng_random_bits here.

    for i in range(1, n_layers):
        w_ref = p_refs[2 * i]
        b_ref = p_refs[2 * i + 1]
        h = (jnp.dot(h.astype(w_ref.dtype), w_ref[...],
                     preferred_element_type=jnp.float32)
             + b_ref[...].astype(jnp.float32))
        if i != n_layers - 1:
            h = jnp.maximum(h, 0.0)

    # Single-pass LayerNorm over the valid columns.  Padded feature columns of
    # h are exactly zero (zero-padded weights/biases), so the raw sums need no
    # masking; gamma/beta are zero-padded so padded output columns stay zero.
    inv_d = jnp.float32(1.0 / d_in)
    s1 = jnp.sum(h, axis=-1, keepdims=True)
    s2 = jnp.sum(h * h, axis=-1, keepdims=True)
    mean = s1 * inv_d
    var = jnp.maximum(s2 * inv_d - mean * mean, 0.0)
    y = (h - mean) * jax.lax.rsqrt(var + eps) * gamma + beta
    out_ref[...] = y.astype(out_ref.dtype)


def pointcloud_image_fusion(image_feature, point_cloud_feature, params,
                            *, tm=512, eps=1e-5, compute_dtype=jnp.bfloat16):
    """image_feature, point_cloud_feature: [B, S, D]  ->  output [B, S, D]."""
    B, S, D = image_feature.shape
    assert point_cloud_feature.shape == (B, S, D)

    weights = params["weights"]     # [(2D, D), (D, D), ...]  stored (in, out)
    biases = params["biases"]       # [(1, D), ...]
    gamma, beta = params["gamma"], params["beta"]
    n_layers = len(weights)
    out_dtype = image_feature.dtype
    in_itemsize = jnp.dtype(image_feature.dtype).itemsize
    out_itemsize = jnp.dtype(out_dtype).itemsize

    M = B * S
    D_pad = _round_up(D, 128)          # lane-dense matmul N / store width
    fuse_concat = (D % 128 == 0)       # in-register concat is lane-aligned

    # Row tiling: never pad rows in HBM; a ragged last tile is masked by
    # Pallas.  Guarantee >=2 grid steps whenever M allows so both v7x
    # TensorCores get work (grid axis marked "parallel"); on single-TC
    # v5e/v6e the extra step costs ~0.35 us, i.e. noise.
    if M >= 2 * tm:
        tm_eff = tm
    elif M >= 16:
        tm_eff = _round_up(pl.cdiv(M, 2), 8)
    else:
        tm_eff = M
    grid = (pl.cdiv(M, tm_eff),)

    # Inputs are passed in their native dtype (no wrapper-side cast/pad pass).
    img = image_feature.reshape(M, D)
    pc = point_cloud_feature.reshape(M, D)

    # Parameters: stacked first weight (the concat never hits HBM), feature
    # dims zero-padded to D_pad, bf16 weights for the MXU, f32 bias/affine
    # for the VPU epilogue (v5e has no bf16 VPU).
    flat_params = [
        _pad_to(weights[0], (2 * D, D_pad)).astype(compute_dtype),
        _pad_to(biases[0], (1, D_pad)).astype(jnp.float32),
    ]
    for i in range(1, n_layers):
        flat_params.append(_pad_to(weights[i], (D_pad, D_pad)).astype(compute_dtype))
        flat_params.append(_pad_to(biases[i], (1, D_pad)).astype(jnp.float32))
    flat_params.append(_pad_to(gamma, (1, D_pad)).astype(jnp.float32))
    flat_params.append(_pad_to(beta, (1, D_pad)).astype(jnp.float32))
    param_bytes = sum(int(p.size) * p.dtype.itemsize for p in flat_params)

    flops = 2 * M * (2 * D * D_pad + (n_layers - 1) * D_pad * D_pad)
    io_bytes = 2 * M * D * in_itemsize + M * D_pad * out_itemsize + param_bytes
    cost = pl.CostEstimate(flops=int(flops), transcendentals=int(M),
                           bytes_accessed=int(io_bytes))

    kernel = functools.partial(_fusion_kernel, n_layers, D, D_pad, eps,
                               fuse_concat)

    def _run(single_buffer_params):
        def _const(shape):
            # Grid-invariant block: fetched once, resident in VMEM.
            nd = len(shape)
            imap = lambda i, _nd=nd: (0,) * _nd
            if single_buffer_params:
                # One buffer is enough for a constant window -> halves the
                # parameter VMEM footprint.
                return pl.BlockSpec(shape, imap, pipeline_mode=pl.Buffered(1))
            return pl.BlockSpec(shape, imap)

        in_specs = [pl.BlockSpec((tm_eff, D), lambda i: (i, 0)),
                    pl.BlockSpec((tm_eff, D), lambda i: (i, 0))]
        in_specs += [_const(p.shape) for p in flat_params]
        out_spec = pl.BlockSpec((tm_eff, D_pad), lambda i: (i, 0))

        # VMEM budget: params x buffer_count + double-buffered I/O tiles +
        # ~3 live f32 temporaries of the hidden tile (+ the bf16 concat tile),
        # with headroom, capped well under the v7x 64 MiB/TC ceiling.
        param_bufs = 1 if single_buffer_params else 2
        tile_io = 2 * tm_eff * D * in_itemsize + tm_eff * D_pad * out_itemsize
        tile_tmp = 3 * tm_eff * D_pad * 4 + tm_eff * 2 * D * 2
        vmem_est = param_bufs * param_bytes + 2 * tile_io + tile_tmp
        vmem_limit = int(min(max(int(1.25 * vmem_est) + (2 << 20), 16 << 20),
                             48 << 20))

        return pl.pallas_call(
            kernel,
            out_shape=jax.ShapeDtypeStruct((M, D_pad), out_dtype),
            grid_spec=pltpu.PrefetchScalarGridSpec(
                num_scalar_prefetch=0,
                grid=grid,
                in_specs=in_specs,
                out_specs=out_spec,
            ),
            compiler_params=pltpu.CompilerParams(
                dimension_semantics=("parallel",),
                vmem_limit_bytes=vmem_limit),
            cost_estimate=cost,
        )(img, pc, *flat_params)

    try:
        out = _run(single_buffer_params=True)
    except Exception:
        # pipeline_mode=pl.Buffered may be unsupported in this JAX build;
        # fall back to default (double-buffered) parameter blocks.
        out = _run(single_buffer_params=False)

    if D_pad != D:
        out = out[:, :D]        # only when D isn't 128-aligned (demo case)
    return out.reshape(B, S, D)


def init_params(key, vis_out_dim, linear_layer_num):
    """Deterministic init mirroring the module's parameter shapes."""
    D = vis_out_dim
    weights, biases = [], []
    for i in range(linear_layer_num):
        in_size = 2 * D if i == 0 else D
        key, kw, kb = jax.random.split(key, 3)
        bound = 1.0 / jnp.sqrt(in_size)
        # stored as (in, out) so the kernel does x @ W
        w = jax.random.uniform(kw, (in_size, D), jnp.float32, -bound, bound)
        b = jax.random.uniform(kb, (1, D), jnp.float32, -bound, bound)
        weights.append(w)
        biases.append(b)
    gamma = jnp.ones((1, D), jnp.float32)
    beta = jnp.zeros((1, D), jnp.float32)
    return {"weights": weights, "biases": biases, "gamma": gamma, "beta": beta}


def _reference(image_feature, point_cloud_feature, params, eps=1e-5):
    x = jnp.concatenate([image_feature, point_cloud_feature], axis=2)
    n = len(params["weights"])
    for i, (w, b) in enumerate(zip(params["weights"], params["biases"])):
        x = x @ w + b
        if i != n - 1:
            x = jnp.maximum(x, 0.0)
    mean = jnp.mean(x, axis=-1, keepdims=True)
    var = jnp.mean((x - mean) ** 2, axis=-1, keepdims=True)
    x = (x - mean) * jax.lax.rsqrt(var + eps)
    return x * params["gamma"][0] + params["beta"][0]


if __name__ == "__main__":
    B, S, D = 2, 8, 32            # batch, seq, args.vis_out_dim
    linear_layer_num = 2          # args.linear_layer_num

    key = jax.random.PRNGKey(0)
    k_img, k_pc, k_param = jax.random.split(key, 3)
    image_feature = jax.random.normal(k_img, (B, S, D), jnp.float32)
    point_cloud_feature = jax.random.normal(k_pc, (B, S, D), jnp.float32)

    params = init_params(k_param, D, linear_layer_num)

    out = pointcloud_image_fusion(image_feature, point_cloud_feature, params)
    out = jax.block_until_ready(out)

    ref = _reference(image_feature, point_cloud_feature, params)
    assert out.shape == (B, S, D)
    # bf16 MXU operands (f32 accumulation / LayerNorm) -> slightly looser
    # tolerance than a pure-f32 pipeline.
    assert jnp.allclose(out, ref, atol=5e-2, rtol=5e-2), (
        "mismatch vs reference: max abs err "
        f"{jnp.max(jnp.abs(out - ref)):.3e}")

    print("KERNEL_OK")
</pallas_src>

<mosaic_0001>
module attributes {stable_mosaic.version = 11 : i64} {
  func.func @_fusion_kernel(%arg0: i32, %arg1: memref<8x32xf32, #tpu.memory_space<vmem>>, %arg2: memref<8x32xf32, #tpu.memory_space<vmem>>, %arg3: memref<64x128xbf16, #tpu.memory_space<vmem>>, %arg4: memref<1x128xf32, #tpu.memory_space<vmem>>, %arg5: memref<128x128xbf16, #tpu.memory_space<vmem>>, %arg6: memref<1x128xf32, #tpu.memory_space<vmem>>, %arg7: memref<1x128xf32, #tpu.memory_space<vmem>>, %arg8: memref<1x128xf32, #tpu.memory_space<vmem>>, %arg9: memref<8x128xf32, #tpu.memory_space<vmem>>) attributes {dimension_semantics = [#tpu.dimension_semantics<parallel>], iteration_bounds = array<i64: 2>, scalar_prefetch = 0 : i64, scratch_operands = 0 : i64, tpu.core_type = #tpu.core_type<tc>, window_params = [{transform_indices = @transform_0, window_bounds = array<i64: 8, 32>}, {transform_indices = @transform_1, window_bounds = array<i64: 8, 32>}, {pipeline_mode = #tpu.pipeline_mode<synchronous>, transform_indices = @transform_2, window_bounds = array<i64: 64, 128>}, {pipeline_mode = #tpu.pipeline_mode<synchronous>, transform_indices = @transform_3, window_bounds = array<i64: 1, 128>}, {pipeline_mode = #tpu.pipeline_mode<synchronous>, transform_indices = @transform_4, window_bounds = array<i64: 128, 128>}, {pipeline_mode = #tpu.pipeline_mode<synchronous>, transform_indices = @transform_5, window_bounds = array<i64: 1, 128>}, {pipeline_mode = #tpu.pipeline_mode<synchronous>, transform_indices = @transform_6, window_bounds = array<i64: 1, 128>}, {pipeline_mode = #tpu.pipeline_mode<synchronous>, transform_indices = @transform_7, window_bounds = array<i64: 1, 128>}, {transform_indices = @transform_8, window_bounds = array<i64: 8, 128>}]} {
    %c0 = arith.constant 0 : index
    %c0_0 = arith.constant 0 : index
    %0 = vector.load %arg7[%c0, %c0_0] : memref<1x128xf32, #tpu.memory_space<vmem>>, vector<1x128xf32>
    %c0_1 = arith.constant 0 : index
    %c0_2 = arith.constant 0 : index
    %1 = vector.load %arg8[%c0_1, %c0_2] : memref<1x128xf32, #tpu.memory_space<vmem>>, vector<1x128xf32>
    %c0_3 = arith.constant 0 : index
    %c0_4 = arith.constant 0 : index
    %2 = vector.load %arg1[%c0_3, %c0_4] : memref<8x32xf32, #tpu.memory_space<vmem>>, vector<8x32xf32>
    %3 = arith.truncf %2 : vector<8x32xf32> to vector<8x32xbf16>
    %c0_5 = arith.constant 0 : index
    %c0_6 = arith.constant 0 : index
    %4 = vector.load %arg2[%c0_5, %c0_6] : memref<8x32xf32, #tpu.memory_space<vmem>>, vector<8x32xf32>
    %5 = arith.truncf %4 : vector<8x32xf32> to vector<8x32xbf16>
    %c0_7 = arith.constant 0 : index
    %c0_8 = arith.constant 0 : index
    %6 = vector.load %arg3[%c0_7, %c0_8] : memref<64x128xbf16, #tpu.memory_space<vmem>>, vector<32x128xbf16>
    %cst = arith.constant dense<0.000000e+00> : vector<8x128xf32>
    %7 = tpu.matmul %3, %6, %cst {dimension_numbers = #tpu.dot_dimension_numbers<[1], [0], [0], [1], [0, 0, 1, 1], [], []>} : vector<8x32xbf16>, vector<32x128xbf16>, vector<8x128xf32> -> vector<8x128xf32>
    %c32 = arith.constant 32 : index
    %c0_9 = arith.constant 0 : index
    %8 = vector.load %arg3[%c32, %c0_9] : memref<64x128xbf16, #tpu.memory_space<vmem>>, vector<32x128xbf16>
    %cst_10 = arith.constant dense<0.000000e+00> : vector<8x128xf32>
    %9 = tpu.matmul %5, %8, %cst_10 {dimension_numbers = #tpu.dot_dimension_numbers<[1], [0], [0], [1], [0, 0, 1, 1], [], []>} : vector<8x32xbf16>, vector<32x128xbf16>, vector<8x128xf32> -> vector<8x128xf32>
    %10 = arith.addf %7, %9 : vector<8x128xf32>
    %c0_11 = arith.constant 0 : index
    %c0_12 = arith.constant 0 : index
    %11 = vector.load %arg4[%c0_11, %c0_12] : memref<1x128xf32, #tpu.memory_space<vmem>>, vector<1x128xf32>
    %12 = vector.broadcast %11 : vector<1x128xf32> to vector<8x128xf32>
    %13 = arith.addf %10, %12 : vector<8x128xf32>
    %cst_13 = arith.constant 0.000000e+00 : f32
    %14 = vector.broadcast %cst_13 : f32 to vector<8x128xf32>
    %15 = arith.maximumf %13, %14 : vector<8x128xf32>
    %16 = arith.truncf %15 : vector<8x128xf32> to vector<8x128xbf16>
    %c0_14 = arith.constant 0 : index
    %c0_15 = arith.constant 0 : index
    %17 = vector.load %arg5[%c0_14, %c0_15] : memref<128x128xbf16, #tpu.memory_space<vmem>>, vector<128x128xbf16>
    %cst_16 = arith.constant dense<0.000000e+00> : vector<8x128xf32>
    %18 = tpu.matmul %16, %17, %cst_16 {dimension_numbers = #tpu.dot_dimension_numbers<[1], [0], [0], [1], [0, 0, 1, 1], [], []>} : vector<8x128xbf16>, vector<128x128xbf16>, vector<8x128xf32> -> vector<8x128xf32>
    %c0_17 = arith.constant 0 : index
    %c0_18 = arith.constant 0 : index
    %19 = vector.load %arg6[%c0_17, %c0_18] : memref<1x128xf32, #tpu.memory_space<vmem>>, vector<1x128xf32>
    %20 = vector.broadcast %19 : vector<1x128xf32> to vector<8x128xf32>
    %21 = arith.addf %18, %20 : vector<8x128xf32>
    %cst_19 = arith.constant dense<0.000000e+00> : vector<8xf32>
    %22 = vector.multi_reduction <add>, %21, %cst_19 [1] : vector<8x128xf32> to vector<8xf32>
    %23 = vector.shape_cast %22 : vector<8xf32> to vector<8x1xf32>
    %24 = arith.mulf %21, %21 : vector<8x128xf32>
    %cst_20 = arith.constant dense<0.000000e+00> : vector<8xf32>
    %25 = vector.multi_reduction <add>, %24, %cst_20 [1] : vector<8x128xf32> to vector<8xf32>
    %26 = vector.shape_cast %25 : vector<8xf32> to vector<8x1xf32>
    %cst_21 = arith.constant 3.125000e-02 : f32
    %27 = vector.broadcast %cst_21 : f32 to vector<8x1xf32>
    %28 = arith.mulf %23, %27 : vector<8x1xf32>
    %cst_22 = arith.constant 3.125000e-02 : f32
    %29 = vector.broadcast %cst_22 : f32 to vector<8x1xf32>
    %30 = arith.mulf %26, %29 : vector<8x1xf32>
    %31 = arith.mulf %28, %28 : vector<8x1xf32>
    %32 = arith.subf %30, %31 : vector<8x1xf32>
    %cst_23 = arith.constant 0.000000e+00 : f32
    %33 = vector.broadcast %cst_23 : f32 to vector<8x1xf32>
    %34 = arith.maximumf %32, %33 : vector<8x1xf32>
    %35 = vector.broadcast %28 : vector<8x1xf32> to vector<8x128xf32>
    %36 = arith.subf %21, %35 : vector<8x128xf32>
    %cst_24 = arith.constant 9.99999974E-6 : f32
    %37 = vector.broadcast %cst_24 : f32 to vector<8x1xf32>
    %38 = arith.addf %34, %37 : vector<8x1xf32>
    %39 = math.rsqrt %38 : vector<8x1xf32>
    %40 = vector.broadcast %39 : vector<8x1xf32> to vector<8x128xf32>
    %41 = arith.mulf %36, %40 : vector<8x128xf32>
    %42 = vector.broadcast %0 : vector<1x128xf32> to vector<8x128xf32>
    %43 = arith.mulf %41, %42 : vector<8x128xf32>
    %44 = vector.broadcast %1 : vector<1x128xf32> to vector<8x128xf32>
    %45 = arith.addf %43, %44 : vector<8x128xf32>
    %c0_25 = arith.constant 0 : index
    %c0_26 = arith.constant 0 : index
    %46 = vector.load %arg9[%c0_25, %c0_26] : memref<8x128xf32, #tpu.memory_space<vmem>>, vector<8x128xf32>
    tpu.vector_store %arg9[%c0_25, %c0_26], %45 {strides = array<i32>} : memref<8x128xf32, #tpu.memory_space<vmem>>, vector<8x128xf32>,
    return
  }
  func.func @transform_0(%arg0: i32) -> (i32, i32) {
    %c0_i32 = arith.constant 0 : i32
    %c0_i32_0 = arith.constant 0 : i32
    return %arg0, %c0_i32 : i32, i32
  }
  func.func @transform_1(%arg0: i32) -> (i32, i32) {
    %c0_i32 = arith.constant 0 : i32
    %c0_i32_0 = arith.constant 0 : i32
    return %arg0, %c0_i32 : i32, i32
  }
  func.func @transform_2(%arg0: i32) -> (i32, i32) {
    %c0_i32 = arith.constant 0 : i32
    %c0_i32_0 = arith.constant 0 : i32
    %c0_i32_1 = arith.constant 0 : i32
    return %c0_i32, %c0_i32_0 : i32, i32
  }
  func.func @transform_3(%arg0: i32) -> (i32, i32) {
    %c0_i32 = arith.constant 0 : i32
    %c0_i32_0 = arith.constant 0 : i32
    %c0_i32_1 = arith.constant 0 : i32
    return %c0_i32, %c0_i32_0 : i32, i32
  }
  func.func @transform_4(%arg0: i32) -> (i32, i32) {
    %c0_i32 = arith.constant 0 : i32
    %c0_i32_0 = arith.constant 0 : i32
    %c0_i32_1 = arith.constant 0 : i32
    return %c0_i32, %c0_i32_0 : i32, i32
  }
  func.func @transform_5(%arg0: i32) -> (i32, i32) {
    %c0_i32 = arith.constant 0 : i32
    %c0_i32_0 = arith.constant 0 : i32
    %c0_i32_1 = arith.constant 0 : i32
    return %c0_i32, %c0_i32_0 : i32, i32
  }
  func.func @transform_6(%arg0: i32) -> (i32, i32) {
    %c0_i32 = arith.constant 0 : i32
    %c0_i32_0 = arith.constant 0 : i32
    %c0_i32_1 = arith.constant 0 : i32
    return %c0_i32, %c0_i32_0 : i32, i32
  }
  func.func @transform_7(%arg0: i32) -> (i32, i32) {
    %c0_i32 = arith.constant 0 : i32
    %c0_i32_0 = arith.constant 0 : i32
    %c0_i32_1 = arith.constant 0 : i32
    return %c0_i32, %c0_i32_0 : i32, i32
  }
  func.func @transform_8(%arg0: i32) -> (i32, i32) {
    %c0_i32 = arith.constant 0 : i32
    %c0_i32_0 = arith.constant 0 : i32
    return %arg0, %c0_i32 : i32, i32
  }
}

module attributes {stable_mosaic.version = 11 : i64} {
  func.func @_fusion_kernel(%arg0: i32, %arg1: memref<8x32xf32, #tpu.memory_space<vmem>>, %arg2: memref<8x32xf32, #tpu.memory_space<vmem>>, %arg3: memref<64x128xbf16, #tpu.memory_space<vmem>>, %arg4: memref<1x128xf32, #tpu.memory_space<vmem>>, %arg5: memref<128x128xbf16, #tpu.memory_space<vmem>>, %arg6: memref<1x128xf32, #tpu.memory_space<vmem>>, %arg7: memref<1x128xf32, #tpu.memory_space<vmem>>, %arg8: memref<1x128xf32, #tpu.memory_space<vmem>>, %arg9: memref<8x128xf32, #tpu.memory_space<vmem>>) attributes {dimension_semantics = [#tpu.dimension_semantics<parallel>], iteration_bounds = array<i64: 2>, scalar_prefetch = 0 : i64, scratch_operands = 0 : i64, tpu.core_type = #tpu.core_type<tc>, window_params = [{transform_indices = @transform_0, window_bounds = array<i64: 8, 32>}, {transform_indices = @transform_1, window_bounds = array<i64: 8, 32>}, {pipeline_mode = #tpu.pipeline_mode<synchronous>, transform_indices = @transform_2, window_bounds = array<i64: 64, 128>}, {pipeline_mode = #tpu.pipeline_mode<synchronous>, transform_indices = @transform_3, window_bounds = array<i64: 1, 128>}, {pipeline_mode = #tpu.pipeline_mode<synchronous>, transform_indices = @transform_4, window_bounds = array<i64: 128, 128>}, {pipeline_mode = #tpu.pipeline_mode<synchronous>, transform_indices = @transform_5, window_bounds = array<i64: 1, 128>}, {pipeline_mode = #tpu.pipeline_mode<synchronous>, transform_indices = @transform_6, window_bounds = array<i64: 1, 128>}, {pipeline_mode = #tpu.pipeline_mode<synchronous>, transform_indices = @transform_7, window_bounds = array<i64: 1, 128>}, {transform_indices = @transform_8, window_bounds = array<i64: 8, 128>}]} {
    %c0 = arith.constant 0 : index
    %c0_0 = arith.constant 0 : index
    %0 = vector.load %arg7[%c0, %c0_0] : memref<1x128xf32, #tpu.memory_space<vmem>>, vector<1x128xf32>
    %c0_1 = arith.constant 0 : index
    %c0_2 = arith.constant 0 : index
    %1 = vector.load %arg8[%c0_1, %c0_2] : memref<1x128xf32, #tpu.memory_space<vmem>>, vector<1x128xf32>
    %c0_3 = arith.constant 0 : index
    %c0_4 = arith.constant 0 : index
    %2 = vector.load %arg1[%c0_3, %c0_4] : memref<8x32xf32, #tpu.memory_space<vmem>>, vector<8x32xf32>
    %3 = arith.truncf %2 : vector<8x32xf32> to vector<8x32xbf16>
    %c0_5 = arith.constant 0 : index
    %c0_6 = arith.constant 0 : index
    %4 = vector.load %arg2[%c0_5, %c0_6] : memref<8x32xf32, #tpu.memory_space<vmem>>, vector<8x32xf32>
    %5 = arith.truncf %4 : vector<8x32xf32> to vector<8x32xbf16>
    %c0_7 = arith.constant 0 : index
    %c0_8 = arith.constant 0 : index
    %6 = vector.load %arg3[%c0_7, %c0_8] : memref<64x128xbf16, #tpu.memory_space<vmem>>, vector<32x128xbf16>
    %cst = arith.constant dense<0.000000e+00> : vector<8x128xf32>
    %7 = tpu.matmul %3, %6, %cst {dimension_numbers = #tpu.dot_dimension_numbers<[1], [0], [0], [1], [0, 0, 1, 1], [], []>} : vector<8x32xbf16>, vector<32x128xbf16>, vector<8x128xf32> -> vector<8x128xf32>
    %c32 = arith.constant 32 : index
    %c0_9 = arith.constant 0 : index
    %8 = vector.load %arg3[%c32, %c0_9] : memref<64x128xbf16, #tpu.memory_space<vmem>>, vector<32x128xbf16>
    %cst_10 = arith.constant dense<0.000000e+00> : vector<8x128xf32>
    %9 = tpu.matmul %5, %8, %cst_10 {dimension_numbers = #tpu.dot_dimension_numbers<[1], [0], [0], [1], [0, 0, 1, 1], [], []>} : vector<8x32xbf16>, vector<32x128xbf16>, vector<8x128xf32> -> vector<8x128xf32>
    %10 = arith.addf %7, %9 : vector<8x128xf32>
    %c0_11 = arith.constant 0 : index
    %c0_12 = arith.constant 0 : index
    %11 = vector.load %arg4[%c0_11, %c0_12] : memref<1x128xf32, #tpu.memory_space<vmem>>, vector<1x128xf32>
    %12 = vector.broadcast %11 : vector<1x128xf32> to vector<8x128xf32>
    %13 = arith.addf %10, %12 : vector<8x128xf32>
    %cst_13 = arith.constant 0.000000e+00 : f32
    %14 = vector.broadcast %cst_13 : f32 to vector<8x128xf32>
    %15 = arith.maximumf %13, %14 : vector<8x128xf32>
    %16 = arith.truncf %15 : vector<8x128xf32> to vector<8x128xbf16>
    %c0_14 = arith.constant 0 : index
    %c0_15 = arith.constant 0 : index
    %17 = vector.load %arg5[%c0_14, %c0_15] : memref<128x128xbf16, #tpu.memory_space<vmem>>, vector<128x128xbf16>
    %cst_16 = arith.constant dense<0.000000e+00> : vector<8x128xf32>
    %18 = tpu.matmul %16, %17, %cst_16 {dimension_numbers = #tpu.dot_dimension_numbers<[1], [0], [0], [1], [0, 0, 1, 1], [], []>} : vector<8x128xbf16>, vector<128x128xbf16>, vector<8x128xf32> -> vector<8x128xf32>
    %c0_17 = arith.constant 0 : index
    %c0_18 = arith.constant 0 : index
    %19 = vector.load %arg6[%c0_17, %c0_18] : memref<1x128xf32, #tpu.memory_space<vmem>>, vector<1x128xf32>
    %20 = vector.broadcast %19 : vector<1x128xf32> to vector<8x128xf32>
    %21 = arith.addf %18, %20 : vector<8x128xf32>
    %cst_19 = arith.constant dense<0.000000e+00> : vector<8xf32>
    %22 = vector.multi_reduction <add>, %21, %cst_19 [1] : vector<8x128xf32> to vector<8xf32>
    %23 = vector.shape_cast %22 : vector<8xf32> to vector<8x1xf32>
    %24 = arith.mulf %21, %21 : vector<8x128xf32>
    %cst_20 = arith.constant dense<0.000000e+00> : vector<8xf32>
    %25 = vector.multi_reduction <add>, %24, %cst_20 [1] : vector<8x128xf32> to vector<8xf32>
    %26 = vector.shape_cast %25 : vector<8xf32> to vector<8x1xf32>
    %cst_21 = arith.constant 3.125000e-02 : f32
    %27 = vector.broadcast %cst_21 : f32 to vector<8x1xf32>
    %28 = arith.mulf %23, %27 : vector<8x1xf32>
    %cst_22 = arith.constant 3.125000e-02 : f32
    %29 = vector.broadcast %cst_22 : f32 to vector<8x1xf32>
    %30 = arith.mulf %26, %29 : vector<8x1xf32>
    %31 = arith.mulf %28, %28 : vector<8x1xf32>
    %32 = arith.subf %30, %31 : vector<8x1xf32>
    %cst_23 = arith.constant 0.000000e+00 : f32
    %33 = vector.broadcast %cst_23 : f32 to vector<8x1xf32>
    %34 = arith.maximumf %32, %33 : vector<8x1xf32>
    %35 = vector.broadcast %28 : vector<8x1xf32> to vector<8x128xf32>
    %36 = arith.subf %21, %35 : vector<8x128xf32>
    %cst_24 = arith.constant 9.99999974E-6 : f32
    %37 = vector.broadcast %cst_24 : f32 to vector<8x1xf32>
    %38 = arith.addf %34, %37 : vector<8x1xf32>
    %39 = math.rsqrt %38 : vector<8x1xf32>
    %40 = vector.broadcast %39 : vector<8x1xf32> to vector<8x128xf32>
    %41 = arith.mulf %36, %40 : vector<8x128xf32>
    %42 = vector.broadcast %0 : vector<1x128xf32> to vector<8x128xf32>
    %43 = arith.mulf %41, %42 : vector<8x128xf32>
    %44 = vector.broadcast %1 : vector<1x128xf32> to vector<8x128xf32>
    %45 = arith.addf %43, %44 : vector<8x128xf32>
    %c0_25 = arith.constant 0 : index
    %c0_26 = arith.constant 0 : index
    %46 = vector.load %arg9[%c0_25, %c0_26] : memref<8x128xf32, #tpu.memory_space<vmem>>, vector<8x128xf32>
    tpu.vector_store %arg9[%c0_25, %c0_26], %45 {strides = array<i32>} : memref<8x128xf32, #tpu.memory_space<vmem>>, vector<8x128xf32>,
    return
  }
  func.func @transform_0(%arg0: i32) -> (i32, i32) {
    %c0_i32 = arith.constant 0 : i32
    %c0_i32_0 = arith.constant 0 : i32
    return %arg0, %c0_i32 : i32, i32
  }
  func.func @transform_1(%arg0: i32) -> (i32, i32) {
    %c0_i32 = arith.constant 0 : i32
    %c0_i32_0 = arith.constant 0 : i32
    return %arg0, %c0_i32 : i32, i32
  }
  func.func @transform_2(%arg0: i32) -> (i32, i32) {
    %c0_i32 = arith.constant 0 : i32
    %c0_i32_0 = arith.constant 0 : i32
    %c0_i32_1 = arith.constant 0 : i32
    return %c0_i32, %c0_i32_0 : i32, i32
  }
  func.func @transform_3(%arg0: i32) -> (i32, i32) {
    %c0_i32 = arith.constant 0 : i32
    %c0_i32_0 = arith.constant 0 : i32
    %c0_i32_1 = arith.constant 0 : i32
    return %c0_i32, %c0_i32_0 : i32, i32
  }
  func.func @transform_4(%arg0: i32) -> (i32, i32) {
    %c0_i32 = arith.constant 0 : i32
    %c0_i32_0 = arith.constant 0 : i32
    %c0_i32_1 = arith.constant 0 : i32
    return %c0_i32, %c0_i32_0 : i32, i32
  }
  func.func @transform_5(%arg0: i32) -> (i32, i32) {
    %c0_i32 = arith.constant 0 : i32
    %c0_i32_0 = arith.constant 0 : i32
    %c0_i32_1 = arith.constant 0 : i32
    return %c0_i32, %c0_i32_0 : i32, i32
  }
  func.func @transform_6(%arg0: i32) -> (i32, i32) {
    %c0_i32 = arith.constant 0 : i32
    %c0_i32_0 = arith.constant 0 : i32
    %c0_i32_1 = arith.constant 0 : i32
    return %c0_i32, %c0_i32_0 : i32, i32
  }
  func.func @transform_7(%arg0: i32) -> (i32, i32) {
    %c0_i32 = arith.constant 0 : i32
    %c0_i32_0 = arith.constant 0 : i32
    %c0_i32_1 = arith.constant 0 : i32
    return %c0_i32, %c0_i32_0 : i32, i32
  }
  func.func @transform_8(%arg0: i32) -> (i32, i32) {
    %c0_i32 = arith.constant 0 : i32
    %c0_i32_0 = arith.constant 0 : i32
    return %arg0, %c0_i32 : i32, i32
  }
}

</mosaic_0001>

<bundles_post_ra>
// kernel: tpu_custom_call.1
= control target key start
LH: loop header
LB: loop body
LE: loop exit
PB: predicated region body
PF: predicated region fallthrough
CT: control target
= control target key end

     0   :  { %s1318_s0 = inlined_call_operand.hbm [shape: f32[16,32], index: 0, kind: input, shape index: {}]   ;;  %s1319_s1 = inlined_call_operand.hbm [shape: f32[16,32], index: 1, kind: input, shape index: {}]   ;;  %s1320_s2 = inlined_call_operand.hbm [shape: bf16[64,128], index: 2, kind: input, shape index: {}]   ;;  %s1321_s3 = inlined_call_operand.vmem [shape: f32[1,128], index: 3, kind: input, shape index: {}]   ;;  %s1322_s4 = inlined_call_operand.hbm [shape: bf16[128,128], index: 4, kind: input, shape index: {}]   ;;  %s1323_s5 = inlined_call_operand.vmem [shape: f32[1,128], index: 5, kind: input, shape index: {}]   ;;  %s1324_s6 = inlined_call_operand.vmem [shape: f32[1,128], index: 6, kind: input, shape index: {}]   ;;  %s1325_s7 = inlined_call_operand.vmem [shape: f32[1,128], index: 7, kind: input, shape index: {}]   ;;  %s1326_s8 = inlined_call_operand.hbm [shape: f32[16,128], index: 8, kind: output, shape index: {}]  }
   0x1   :  { %1332 = sst [smem:[#allocation21_spill]] %s1320_s2 }
   0x2   :  { %1333 = sst [smem:[#allocation22_spill]] %s1322_s4 }
   0x3   :  { %13 = vsyncpa [#allocation3], 0 }
   0x4   :  { %15 = vsyncpa [#allocation3 + $0x1], 0 }
   0x5   :  { %16 = vsyncpa [#allocation6], 0 }
   0x6   :  { %18 = vsyncpa [#allocation6 + $0x1], 0 }
   0x7   :  { %19 = vsyncpa [#allocation9], 0 }
   0x8   :  { %20 = vsyncpa [#allocation4], 0 }
   0x9   :  { %22 = vsyncpa [#allocation4 + $0x1], 0  ;;  %s1125_s27 = smov 0   ;;  %s1127_s28 = smov 0  }
   0xa   :  { %s1129_s29 = smov 0   ;;  %s1131_s30 = smov 0  }
   0xb LB: > { %1334 = sst [smem:[#allocation16_spill]] %s1070_s29  ;;  %s1149_s12 = sadd.s32 4294967295, %s1074_s30   ;;  %s1074_s30 = sphi %s1131_s30, %s1350_s30   ;;  %s1070_s29 = sphi %s1129_s29, %s1352_s29   ;;  %s1066_s28 = sphi %s1127_s28, %s1354_s28   ;;  %s1062_s27 = sphi %s1125_s27, %s1353_s27  }
   0xc   : > { %1335 = sst [smem:[#allocation17_spill]] %s1074_s30  ;;  %p716_p0 = scmp.ge.s32.totalorder %s1074_s30, 1 }
   0xd   : > { %s1336_s2 = sld [smem:[#allocation21_spill]]  ;;  %p49_p1 = scmp.eq.s32.totalorder %s1149_s12, 0 }
   0xe   : > { %p237_p2 = scmp.lt.s32.totalorder %s1074_s30, 3  ;;  %s1076_s14 = smov [#allocation7]  }
   0xf   : > { %s250_s15 = sshll.u32 %s1076_s14, 4  ;;  %s1338_s4 = sld [smem:[#allocation22_spill]]  ;;  %s251_s15 = int_to_ptr.vmem [resolvable:$true] %s250_s15 }
  0x10   : > { %p1154_p3 = pnand %p716_p0, %p237_p2  ;;  %s1077_s19 = smov [#allocation8]  }
  0x11   : > { %s267_s20 = sshll.u32 %s1077_s19, 4  ;;  %s1078_s21 = smov 64   ;;  %s268_s20 = int_to_ptr.vmem [resolvable:$true] %s267_s20 }
  0x12   : > { %p810_p4 = pneg %p1154_p3  ;;  %s1079_s22 = smov 4  }
  0x13   : > { %s248_s11 = sshll.u32 %s1336_s2, 4  ;;  %s715_s23 = sadd.s32 4294967294, %s1074_s30   ;;  %s249_s11 = int_to_ptr.hbm [resolvable:$true] %s248_s11 }
  0x14   : > { %p811_p6 = pnand %p810_p4, %p49_p1  ;;  %s1168_s24 = sadd.s32 1, %s1074_s30  }
  0x15   : > { %s265_s18 = sshll.u32 %s1338_s4, 4  ;;  %1339 = sst [smem:[#allocation18_spill]] %s1168_s24  ;;  %s266_s18 = int_to_ptr.hbm [resolvable:$true] %s265_s18 }
  0x16   : > { %813 = dma.hbm_to_vmem [thread:$0]  (!%p811_p6), %s249_s11, 512, %s251_s15, [#allocation6], %s1078_s21, %s1078_s21, %s1079_s22  }
  0x17   : > { %816 = dma.hbm_to_vmem [thread:$0]  (!%p811_p6), %s266_s18, 1024, %s268_s20, [#allocation9], %s1078_s21, %s1078_s21, %s1079_s22  }
  0x18   : > { %s32_s25 = ssub.s32 %s1074_s30, %s1168_s24  ;;  %s35_s26 = sadd.s32 1, %s1070_s29 }
  0x19   : > { %p33_p7 = scmp.eq.s32.totalorder %s32_s25, 0  ;;  %p42_p8 = scmp.ne.s32.totalorder %s1070_s29, %s1066_s28 }
  0x1a   : > { %p43_p9 = scmp.eq.s32.totalorder %s1074_s30, 0  ;;  %p48_p10 = scmp.ne.s32.totalorder %s1066_s28, %s1062_s27 }
  0x1b   : > { %s1179_s9 = scalar_select %p33_p7, %s1070_s29, %s35_s26  }
  0x1c   : > { %p1181_p11 = por %p43_p9, %p42_p8  ;;  %p1187_p12 = por %p49_p1, %p48_p10 }
  0x1d   : > { %1340 = sst [smem:[#allocation19_spill]] %s1179_s9  ;;  %p224_p13 = scmp.eq.s32.totalorder %s1149_s12, 1 }
  0x1e   : > { %p230_p0 = scmp.eq.s32.totalorder %s715_s23, 1  ;;  %p830_p2 = scmp.lt.s32.totalorder %s1074_s30, 2 }
  0x1f   : > { %s290_s14 = sand.u32 1, %s1070_s29   ;;  %p1194_p4 = por %p224_p13, %p42_p8 }
  0x20   : > { %p1198_p6 = por %p230_p0, %p48_p10  ;;  %s1202_s17 = sshll.u32 %s290_s14, 3 }
  0x21   : > { %s721_s18 = sshll.u32 %s1074_s30, 3  ;;  %s294_s22 = scalar_lea.vmem [#allocation2], %s1202_s17 }
  0x22   : > { %s1344_s16 = scalar_select %p1198_p6, 1, 0 }
  0x23   : > { %s298_s21 = scalar_lea.hbm %s1318_s0, %s721_s18  ;;  %s302_s23 = sshll.u32 %s294_s22, 4  ;;  %s303_s23 = int_to_ptr.vmem [resolvable:$true] %s302_s23 }
  0x24   : > { %1345 = sst [smem:[#allocation20_spill]] %s1344_s16  ;;  %s300_s25 = sshll.u32 %s298_s21, 4  ;;  %s301_s25 = int_to_ptr.hbm [resolvable:$true] %s300_s25 }
  0x25   : > { %p1211_p7 = pnand %p830_p2, %p1181_p11  ;;  %s317_s9 = scalar_lea.hbm %s1319_s1, %s721_s18 }
  0x26   : > { %s309_s29 = sand.u32 1, %s1074_s30   ;;  %s291_s24 = scalar_lea.sflag [#allocation3], %s290_s14 }
  0x27   : > { %s936_s19 = sshra.s32 %s301_s25, 4  ;;  %p940_p9 = pneg %p1211_p7  ;;  %s937_s19 = int_to_ptr.hbm [resolvable:$true] %s936_s19 }
  0x28   : > { %s938_s20 = scalar_lea.hbm %s937_s19, 8  ;;  %s943_s22 = scalar_lea.hbm %s1318_s0, 16 }
  0x29   : > { %p939_p8 = scmp.ne.s32.totalorder %s937_s19, %s938_s20  ;;  %p944_p13 = scmp.lt.s32.totalorder %s937_s19, %s1318_s0 }
  0x2a   : > { %p945_p0 = scmp.lt.s32.totalorder %s943_s22, %s938_s20 }
  0x2b   : > { %p941_p10 = pnand %p940_p9, %p939_p8 }
  0x2c   : > { %p946_p2 = por %p945_p0, %p944_p13 }
  0x2d   : > { %p942_p11 = pneg %p941_p10 }
  0x2f   : > { %p947_p5 = pnand %p946_p2, %p942_p11 }
  0x31   : > { %950 = shalt.err (!%p947_p5)
}
  0x32   : > { %820 = dma.hbm_to_vmem [thread:$0]  (!%p1211_p7), %s301_s25, 128, %s303_s23, %s291_s24  }
  0x33   : > { %s319_s14 = sshll.u32 %s317_s9, 4  ;;  %s313_s18 = scalar_lea.vmem [#allocation5], %s1202_s17  ;;  %s320_s14 = int_to_ptr.hbm [resolvable:$true] %s319_s14 }
  0x34   : > { %s321_s30 = sshll.u32 %s313_s18, 4  ;;  %s310_s10 = scalar_lea.sflag [#allocation6], %s309_s29  ;;  %s322_s30 = int_to_ptr.vmem [resolvable:$true] %s321_s30 }
  0x35   : > { %s966_s21 = sshra.s32 %s320_s14, 4  ;;  %s973_s22 = scalar_lea.hbm %s1319_s1, 16  ;;  %s967_s21 = int_to_ptr.hbm [resolvable:$true] %s966_s21 }
  0x36   : > { %s968_s16 = scalar_lea.hbm %s967_s21, 8  ;;  %p974_p5 = scmp.lt.s32.totalorder %s967_s21, %s1319_s1 }
  0x37   : > { %p969_p8 = scmp.ne.s32.totalorder %s967_s21, %s968_s16  ;;  %p975_p13 = scmp.lt.s32.totalorder %s973_s22, %s968_s16 }
  0x39   : > { %p971_p10 = pnand %p969_p8, %p940_p9  ;;  %p976_p0 = por %p975_p13, %p974_p5 }
  0x3b   : > { %p972_p11 = pneg %p971_p10 }
  0x3d   : > { %p977_p2 = pnand %p976_p0, %p972_p11 }
  0x3f   : > { %980 = shalt.err (!%p977_p2)
}
  0x40   : > { %823 = dma.hbm_to_vmem [thread:$0]  (!%p1211_p7), %s320_s14, 128, %s322_s30, %s310_s10  }
  0x41   : > { %330 = sbr.rel (%p1154_p3) target bundleno = 513 (0x201), region = 52  ;;  %s1247_s29 = sand.u32 (!%p1154_p3), 1, %s1066_s28  }
  0x42   : > { %s1250_s9 = sshll.u32 (!%p1154_p3), %s1247_s29, 3  ;;  %s333_s17 = scalar_lea.sflag (!%p1154_p3), [#allocation3], %s1247_s29 }
  0x43   : > { %s336_s16 = scalar_lea.vmem (!%p1154_p3), [#allocation2], %s1250_s9 }
  0x46   : > { %1041 = dma.done.wait (%p1187_p12), %s333_s17, 128  }
  0x47   : > { %1043 = vsyncadd (%p1187_p12), %s333_s17, 4294967168  ;;  %s342_s30 = sand.u32 1, %s1149_s12   ;;  %s346_s23 = scalar_lea.vmem [#allocation5], %s1250_s9 }
  0x48   : > { %s343_s13 = scalar_lea.sflag [#allocation6], %s342_s30 }
  0x49   : > { %1045 = dma.done.wait (%p1187_p12), %s343_s13, 128  }
  0x4a   : > { %1047 = vsyncadd (%p1187_p12), %s343_s13, 4294967168 }
  0x4b   : > { %1049 = dma.done.wait (%p49_p1), [#allocation6], 512  }
  0x4c   : > { %1051 = vsyncadd (%p49_p1), [#allocation6], 4294966784 }
  0x4d   : > { %1053 = dma.done.wait (%p49_p1), [#allocation9], 1024  }
  0x4e   : > { %1055 = vsyncadd (%p49_p1), [#allocation9], 4294966272  ;;  %v787_v0 = vld [vmem:[#allocation7 + $0x18] sm:$0xff]  ;;  %v785_v1 = vld [vmem:[#allocation7 + $0x8] sm:$0xff]  ;;  %vm422_vm0 = vcmask 261120   ;;  %s781_s14 = sshll.u32 %s1149_s12, 3 }
  0x4f   : > { %v786_v2 = vld [vmem:[#allocation7 + $0x10] sm:$0xff]  ;;  %v784_v3 = vld [vmem:[#allocation7] sm:$0xff]  ;;  %432 = vmatpush.bf16.msra.mxu0 %v787_v0  ;;  %460 = vmatpush.bf16.msra.mxu1 %v785_v1  ;;  %v795_v6 = vld [vmem:[#allocation8 + $0x38] sm:$0xff]  ;;  %s598_s20 = scalar_lea.hbm %s1326_s8, %s781_s14  ;;  %s394_s12 = scalar_lea.vmem [#allocation10], %s1250_s9 }
  0x50   : > { %v400_v4 = vld [vmem:[%s346_s23] sm:$0xff]  ;;  %v398_v5 = vld [vmem:[%s336_s16] sm:$0xff]  ;;  %542 = vmatpush.bf16.msra.mxu2 %v795_v6  ;;  %s600_s24 = sshll.u32 %s394_s12, 4  ;;  %s602_s17 = sshll.u32 %s598_s20, 4  ;;  %s601_s24 = int_to_ptr.vmem [resolvable:$true] %s600_s24  ;;  %s603_s17 = int_to_ptr.hbm [resolvable:$true] %s602_s17 }
  0x51   : > { %v794_v7 = vld [vmem:[#allocation8 + $0x30] sm:$0xff]  ;;  %v401_v8 = vpack.c.bf16 %v400_v4, %v400_v4  ;;  %v399_v9 = vpack.c.bf16 %v398_v5, %v398_v5  ;;  %v793_v10 = vld [vmem:[#allocation8 + $0x28] sm:$0xff]  ;;  %v792_v11 = vld [vmem:[#allocation8 + $0x20] sm:$0xff]  ;;  %s588_s16 = scalar_lea.sflag [#allocation4], %s1247_s29  ;;  %s1010_s30 = sshra.s32 %s603_s17, 4  ;;  %s1011_s30 = int_to_ptr.hbm [resolvable:$true] %s1010_s30 }
  0x52   : > { %v791_v12 = vld [vmem:[#allocation8 + $0x18] sm:$0xff]  ;;  %v790_v13 = vld [vmem:[#allocation8 + $0x10] sm:$0xff]  ;;  %v789_v14 = vld [vmem:[#allocation8 + $0x8] sm:$0xff]  ;;  %s1012_s13 = scalar_lea.hbm %s1011_s30, 8  ;;  %s1016_s25 = scalar_lea.hbm %s1326_s8, 16 }
  0x53   : > { %433 = vmatpush.bf16.msra.mxu0 %v786_v2  ;;  %461 = vmatpush.bf16.msra.mxu1 %v784_v3  ;;  %v788_v15 = vld [vmem:[#allocation8] sm:$0xff]  ;;  %p1013_p1 = scmp.ne.s32.totalorder %s1011_s30, %s1012_s13  ;;  %p1017_p7 = scmp.lt.s32.totalorder %s1011_s30, %s1326_s8 }
  0x54   : > { %543 = vmatpush.bf16.msra.mxu2 %v794_v7  ;;  %v870_v16 = vld [vmem:[%s1321_s3] ss:$0 sm:$0xff]  ;;  %p1018_p9 = scmp.lt.s32.totalorder %s1016_s25, %s1012_s13 }
  0x55   : > { %v871_v25 = vld [vmem:[%s1323_s5] ss:$0 sm:$0xff]  ;;  %p1014_p3 = pnand %p1013_p1, %p1194_p4 }
  0x56   : > { %738 = vmatmul.msk.bf16.vlgmr.msra.gmra.mxu0 %vm422_vm0, %v401_v8  ;;  %747 = vmatmul.msk.bf16.vlgmr.msra.gmra.mxu1 %vm422_vm0, %v399_v9  ;;  %v872_v45 = vld [vmem:[%s1324_s6] ss:$0 sm:$0xff]  ;;  %p1019_p8 = por %p1018_p9, %p1017_p7 }
  0x57   : > { %v873_v48 = vld [vmem:[%s1325_s7] ss:$0 sm:$0xff]  ;;  %p1015_p12 = pneg %p1014_p3 }
  0x58   : > { %544 = vmatpush.bf16.msra.mxu2 %v793_v10 }
  0x59   : > { %p1020_p10 = pnand %p1019_p8, %p1015_p12 }
  0x5c   : > { %545 = vmatpush.bf16.msra.mxu2 %v792_v11 }
  0x60   : > { %546 = vmatpush.bf16.msra.mxu2 %v791_v12 }
  0x64   : > { %547 = vmatpush.bf16.msra.mxu2 %v790_v13 }
  0x68   : > { %548 = vmatpush.bf16.msra.mxu2 %v789_v14 }
  0x6c   : > { %549 = vmatpush.bf16.msra.mxu2 %v788_v15 }
  0xd3   : > { %v435_v17 = vpop.f32.mrf.mxu0  ;;  %v463_v18 = vpop.f32.mrf.mxu1 }
  0xd4   : > { %v464_v19 = vadd.f32 %v463_v18, %v435_v17 }
  0xd6   : > { %v471_v20 = vadd.f32 %v870_v16, %v464_v19 }
  0xd8   : > { %v472_v21 = vmax.f32 %v471_v20, 0.0 }
  0xda   : > { %v473_v22 = vpack.c.bf16 %v472_v21, %v472_v21 }
  0xdb   : > { %v437_v23 = vpop.f32.mrf.mxu0  ;;  %v465_v24 = vpop.f32.mrf.mxu1 }
  0xdc   : > { %550 = vmatmul.bf16.vlgmr.msra.gmra.mxu2 %v473_v22 }
 0x15f   : > { %v551_v26 = vpop.f32.mrf.mxu2 }
 0x160   : > { %v552_v27 = vadd.f32 %v871_v25, %v551_v26 }
 0x162   : > { %555 = vadd.xlane.f32.xlu0 %v552_v27  ;;  %v557_v29 = vmul.f32 %v552_v27, %v552_v27 }
 0x167   : > { %v553_v28 = vpop.f32.mrf.mxu2 }
 0x16a   : > { %558 = vadd.xlane.f32.xlu0 %v557_v29 }
 0x1d5   : > { %v556_v30 = vpop.xlane.xlu0 %555 }
 0x1d6   : > { %v560_v31 = vmul.f32 0.03125, %v556_v30 }
 0x1d8   : > { %v562_v33 = vmul.f32 %v560_v31, %v560_v31  ;;  %v565_v44 = vsub.f32 %v552_v27, %v560_v31 }
 0x1dd   : > { %v559_v32 = vpop.xlane.xlu0 %558 }
 0x1de   : > { %v561_v34 = vmul.f32 0.03125, %v559_v32 }
 0x1e0   : > { %v563_v35 = vsub.f32 %v561_v34, %v562_v33 }
 0x1e2   : > { %v564_v36 = vmax.f32 %v563_v35, 0.0 }
 0x1e4   : > { %v566_v37 = vadd.f32 1e-05, %v564_v36 }
 0x1e6   : > { %874 = vrsqrt.f32 %v566_v37  ;;  %vm573_vm2 = vweird.f32 %v566_v37 }
 0x1ec   : > { %v875_v38 = vpop.eup %874 }
 0x1ed   : > { %v568_v39 = vmul.f32 %v875_v38, %v566_v37  ;;  %vm574_vm1 = vweird.f32 %v875_v38 }
 0x1ee   : > { %vm575_vm3 = vmor %vm573_vm2, %vm574_vm1 }
 0x1ef   : > { %v569_v40 = vmul.f32 %v875_v38, %v568_v39 }
 0x1f1   : > { %v570_v41 = vmul.f32 0.5, %v569_v40 }
 0x1f3   : > { %v571_v42 = vsub.f32 1.5, %v570_v41 }
 0x1f5   : > { %v572_v43 = vmul.f32 %v875_v38, %v571_v42 }
 0x1f7   : > { %v576_v46 = vsel %vm575_vm3, %v875_v38, %v572_v43 }
 0x1f8   : > { %v577_v47 = vmul.f32 %v576_v46, %v565_v44 }
 0x1fa   : > { %v581_v49 = vmul.f32 %v872_v45, %v577_v47 }
 0x1fc   : > { %v585_v50 = vadd.f32 %v873_v48, %v581_v49 }
 0x1fe   : > { %586 = vst [vmem:[%s394_s12] sm:$0xff] %v585_v50 }
 0x1ff   : > { %1023 = shalt.err (!%p1020_p10)
}
 0x200   : > { %808 = dma.vmem_to_hbm [thread:$0]  (%p1194_p4), %s601_s24, 128, %s603_s17, %s588_s16  }
 0x201 PF: > { %s1348_s4 = sld [smem:[#allocation17_spill]]  ;;  %s614_s14 = sand.u32 1, %s1062_s27  }
 0x202   : > { %s615_s18 = scalar_lea.sflag [#allocation4], %s614_s14 }
 0x207   : > { %p1349_p11 = scmp.ge.s32.totalorder %s1348_s4, 2 }
 0x209   : > { %p825_p5 = pnand %p1349_p11, %p1198_p6 }
 0x20b   : > { %p826_p13 = pneg %p825_p5 }
 0x20d   : > { %1057 = dma.done.wait (%p826_p13), %s615_s18, 128  }
 0x20e   : > { %1059 = vsyncadd (%p826_p13), %s615_s18, 4294967168  ;;  %s1350_s30 = sld [smem:[#allocation18_spill]]  ;;  %s1353_s27 = smov %s1066_s28 }
 0x20f   : > { %s1351_s10 = sld [smem:[#allocation16_spill]] }
 0x210   : > { %s1352_s29 = sld [smem:[#allocation19_spill]] }
 0x214   : > { %p25_p0 = scmp.ge.s32.totalorder %s1350_s30, 4  }
 0x215   : > { %s1354_s28 = smov %s1351_s10 }
 0x216   :  { %27 = sbr.rel (!%p25_p0) target bundleno = 11 (0xb), region = 118 }
 0x21b   :  { %621 = vsyncpa [#allocation3], 1 }
 0x21c   :  { %623 = vsyncpa [#allocation3 + $0x1], 1 }
 0x21d   :  { %624 = vsyncpa [#allocation6], 1 }
 0x21e   :  { %626 = vsyncpa [#allocation6 + $0x1], 1 }
 0x21f   :  { %627 = vsyncpa [#allocation9], 1 }
 0x220   :  { %628 = vsyncpa [#allocation4], 1 }
 0x221   :  { %630 = vsyncpa [#allocation4 + $0x1], 1 }

// kernel: tpu_custom_call.1
= control target key start
LH: loop header
LB: loop body
LE: loop exit
PB: predicated region body
PF: predicated region fallthrough
CT: control target
= control target key end

     0   :  { %s1318_s0 = inlined_call_operand.hbm [shape: f32[16,32], index: 0, kind: input, shape index: {}]   ;;  %s1319_s1 = inlined_call_operand.hbm [shape: f32[16,32], index: 1, kind: input, shape index: {}]   ;;  %s1320_s2 = inlined_call_operand.hbm [shape: bf16[64,128], index: 2, kind: input, shape index: {}]   ;;  %s1321_s3 = inlined_call_operand.vmem [shape: f32[1,128], index: 3, kind: input, shape index: {}]   ;;  %s1322_s4 = inlined_call_operand.hbm [shape: bf16[128,128], index: 4, kind: input, shape index: {}]   ;;  %s1323_s5 = inlined_call_operand.vmem [shape: f32[1,128], index: 5, kind: input, shape index: {}]   ;;  %s1324_s6 = inlined_call_operand.vmem [shape: f32[1,128], index: 6, kind: input, shape index: {}]   ;;  %s1325_s7 = inlined_call_operand.vmem [shape: f32[1,128], index: 7, kind: input, shape index: {}]   ;;  %s1326_s8 = inlined_call_operand.hbm [shape: f32[16,128], index: 8, kind: output, shape index: {}]  }
   0x1   :  { %1332 = sst [smem:[#allocation21_spill]] %s1320_s2 }
   0x2   :  { %1333 = sst [smem:[#allocation22_spill]] %s1322_s4 }
   0x3   :  { %13 = vsyncpa [#allocation3], 0 }
   0x4   :  { %15 = vsyncpa [#allocation3 + $0x1], 0 }
   0x5   :  { %16 = vsyncpa [#allocation6], 0 }
   0x6   :  { %18 = vsyncpa [#allocation6 + $0x1], 0 }
   0x7   :  { %19 = vsyncpa [#allocation9], 0 }
   0x8   :  { %20 = vsyncpa [#allocation4], 0 }
   0x9   :  { %22 = vsyncpa [#allocation4 + $0x1], 0  ;;  %s1125_s27 = smov 0   ;;  %s1127_s28 = smov 0  }
   0xa   :  { %s1129_s29 = smov 0   ;;  %s1131_s30 = smov 0  }
   0xb LB: > { %1334 = sst [smem:[#allocation16_spill]] %s1070_s29  ;;  %s1149_s12 = sadd.s32 4294967295, %s1074_s30   ;;  %s1074_s30 = sphi %s1131_s30, %s1350_s30   ;;  %s1070_s29 = sphi %s1129_s29, %s1352_s29   ;;  %s1066_s28 = sphi %s1127_s28, %s1354_s28   ;;  %s1062_s27 = sphi %s1125_s27, %s1353_s27  }
   0xc   : > { %1335 = sst [smem:[#allocation17_spill]] %s1074_s30  ;;  %p716_p0 = scmp.ge.s32.totalorder %s1074_s30, 1 }
   0xd   : > { %s1336_s2 = sld [smem:[#allocation21_spill]]  ;;  %p49_p1 = scmp.eq.s32.totalorder %s1149_s12, 0 }
   0xe   : > { %p237_p2 = scmp.lt.s32.totalorder %s1074_s30, 3  ;;  %s1076_s14 = smov [#allocation7]  }
   0xf   : > { %s250_s15 = sshll.u32 %s1076_s14, 4  ;;  %s1338_s4 = sld [smem:[#allocation22_spill]]  ;;  %s251_s15 = int_to_ptr.vmem [resolvable:$true] %s250_s15 }
  0x10   : > { %p1154_p3 = pnand %p716_p0, %p237_p2  ;;  %s1077_s19 = smov [#allocation8]  }
  0x11   : > { %s267_s20 = sshll.u32 %s1077_s19, 4  ;;  %s1078_s21 = smov 64   ;;  %s268_s20 = int_to_ptr.vmem [resolvable:$true] %s267_s20 }
  0x12   : > { %p810_p4 = pneg %p1154_p3  ;;  %s1079_s22 = smov 4  }
  0x13   : > { %s248_s11 = sshll.u32 %s1336_s2, 4  ;;  %s715_s23 = sadd.s32 4294967294, %s1074_s30   ;;  %s249_s11 = int_to_ptr.hbm [resolvable:$true] %s248_s11 }
  0x14   : > { %p811_p6 = pnand %p810_p4, %p49_p1  ;;  %s1168_s24 = sadd.s32 1, %s1074_s30  }
  0x15   : > { %s265_s18 = sshll.u32 %s1338_s4, 4  ;;  %1339 = sst [smem:[#allocation18_spill]] %s1168_s24  ;;  %s266_s18 = int_to_ptr.hbm [resolvable:$true] %s265_s18 }
  0x16   : > { %813 = dma.hbm_to_vmem [thread:$0]  (!%p811_p6), %s249_s11, 512, %s251_s15, [#allocation6], %s1078_s21, %s1078_s21, %s1079_s22  }
  0x17   : > { %816 = dma.hbm_to_vmem [thread:$0]  (!%p811_p6), %s266_s18, 1024, %s268_s20, [#allocation9], %s1078_s21, %s1078_s21, %s1079_s22  }
  0x18   : > { %s32_s25 = ssub.s32 %s1074_s30, %s1168_s24  ;;  %s35_s26 = sadd.s32 1, %s1070_s29 }
  0x19   : > { %p33_p7 = scmp.eq.s32.totalorder %s32_s25, 0  ;;  %p42_p8 = scmp.ne.s32.totalorder %s1070_s29, %s1066_s28 }
  0x1a   : > { %p43_p9 = scmp.eq.s32.totalorder %s1074_s30, 0  ;;  %p48_p10 = scmp.ne.s32.totalorder %s1066_s28, %s1062_s27 }
  0x1b   : > { %s1179_s9 = scalar_select %p33_p7, %s1070_s29, %s35_s26  }
  0x1c   : > { %p1181_p11 = por %p43_p9, %p42_p8  ;;  %p1187_p12 = por %p49_p1, %p48_p10 }
  0x1d   : > { %1340 = sst [smem:[#allocation19_spill]] %s1179_s9  ;;  %p224_p13 = scmp.eq.s32.totalorder %s1149_s12, 1 }
  0x1e   : > { %p230_p0 = scmp.eq.s32.totalorder %s715_s23, 1  ;;  %p830_p2 = scmp.lt.s32.totalorder %s1074_s30, 2 }
  0x1f   : > { %s290_s14 = sand.u32 1, %s1070_s29   ;;  %p1194_p4 = por %p224_p13, %p42_p8 }
  0x20   : > { %p1198_p6 = por %p230_p0, %p48_p10  ;;  %s1202_s17 = sshll.u32 %s290_s14, 3 }
  0x21   : > { %s721_s18 = sshll.u32 %s1074_s30, 3  ;;  %s294_s22 = scalar_lea.vmem [#allocation2], %s1202_s17 }
  0x22   : > { %s1344_s16 = scalar_select %p1198_p6, 1, 0 }
  0x23   : > { %s298_s21 = scalar_lea.hbm %s1318_s0, %s721_s18  ;;  %s302_s23 = sshll.u32 %s294_s22, 4  ;;  %s303_s23 = int_to_ptr.vmem [resolvable:$true] %s302_s23 }
  0x24   : > { %1345 = sst [smem:[#allocation20_spill]] %s1344_s16  ;;  %s300_s25 = sshll.u32 %s298_s21, 4  ;;  %s301_s25 = int_to_ptr.hbm [resolvable:$true] %s300_s25 }
  0x25   : > { %p1211_p7 = pnand %p830_p2, %p1181_p11  ;;  %s317_s9 = scalar_lea.hbm %s1319_s1, %s721_s18 }
  0x26   : > { %s309_s29 = sand.u32 1, %s1074_s30   ;;  %s291_s24 = scalar_lea.sflag [#allocation3], %s290_s14 }
  0x27   : > { %s936_s19 = sshra.s32 %s301_s25, 4  ;;  %p940_p9 = pneg %p1211_p7  ;;  %s937_s19 = int_to_ptr.hbm [resolvable:$true] %s936_s19 }
  0x28   : > { %s938_s20 = scalar_lea.hbm %s937_s19, 8  ;;  %s943_s22 = scalar_lea.hbm %s1318_s0, 16 }
  0x29   : > { %p939_p8 = scmp.ne.s32.totalorder %s937_s19, %s938_s20  ;;  %p944_p13 = scmp.lt.s32.totalorder %s937_s19, %s1318_s0 }
  0x2a   : > { %p945_p0 = scmp.lt.s32.totalorder %s943_s22, %s938_s20 }
  0x2b   : > { %p941_p10 = pnand %p940_p9, %p939_p8 }
  0x2c   : > { %p946_p2 = por %p945_p0, %p944_p13 }
  0x2d   : > { %p942_p11 = pneg %p941_p10 }
  0x2f   : > { %p947_p5 = pnand %p946_p2, %p942_p11 }
  0x31   : > { %950 = shalt.err (!%p947_p5)
}
  0x32   : > { %820 = dma.hbm_to_vmem [thread:$0]  (!%p1211_p7), %s301_s25, 128, %s303_s23, %s291_s24  }
  0x33   : > { %s319_s14 = sshll.u32 %s317_s9, 4  ;;  %s313_s18 = scalar_lea.vmem [#allocation5], %s1202_s17  ;;  %s320_s14 = int_to_ptr.hbm [resolvable:$true] %s319_s14 }
  0x34   : > { %s321_s30 = sshll.u32 %s313_s18, 4  ;;  %s310_s10 = scalar_lea.sflag [#allocation6], %s309_s29  ;;  %s322_s30 = int_to_ptr.vmem [resolvable:$true] %s321_s30 }
  0x35   : > { %s966_s21 = sshra.s32 %s320_s14, 4  ;;  %s973_s22 = scalar_lea.hbm %s1319_s1, 16  ;;  %s967_s21 = int_to_ptr.hbm [resolvable:$true] %s966_s21 }
  0x36   : > { %s968_s16 = scalar_lea.hbm %s967_s21, 8  ;;  %p974_p5 = scmp.lt.s32.totalorder %s967_s21, %s1319_s1 }
  0x37   : > { %p969_p8 = scmp.ne.s32.totalorder %s967_s21, %s968_s16  ;;  %p975_p13 = scmp.lt.s32.totalorder %s973_s22, %s968_s16 }
  0x39   : > { %p971_p10 = pnand %p969_p8, %p940_p9  ;;  %p976_p0 = por %p975_p13, %p974_p5 }
  0x3b   : > { %p972_p11 = pneg %p971_p10 }
  0x3d   : > { %p977_p2 = pnand %p976_p0, %p972_p11 }
  0x3f   : > { %980 = shalt.err (!%p977_p2)
}
  0x40   : > { %823 = dma.hbm_to_vmem [thread:$0]  (!%p1211_p7), %s320_s14, 128, %s322_s30, %s310_s10  }
  0x41   : > { %330 = sbr.rel (%p1154_p3) target bundleno = 513 (0x201), region = 52  ;;  %s1247_s29 = sand.u32 (!%p1154_p3), 1, %s1066_s28  }
  0x42   : > { %s1250_s9 = sshll.u32 (!%p1154_p3), %s1247_s29, 3  ;;  %s333_s17 = scalar_lea.sflag (!%p1154_p3), [#allocation3], %s1247_s29 }
  0x43   : > { %s336_s16 = scalar_lea.vmem (!%p1154_p3), [#allocation2], %s1250_s9 }
  0x46   : > { %1041 = dma.done.wait (%p1187_p12), %s333_s17, 128  }
  0x47   : > { %1043 = vsyncadd (%p1187_p12), %s333_s17, 4294967168  ;;  %s342_s30 = sand.u32 1, %s1149_s12   ;;  %s346_s23 = scalar_lea.vmem [#allocation5], %s1250_s9 }
  0x48   : > { %s343_s13 = scalar_lea.sflag [#allocation6], %s342_s30 }
  0x49   : > { %1045 = dma.done.wait (%p1187_p12), %s343_s13, 128  }
  0x4a   : > { %1047 = vsyncadd (%p1187_p12), %s343_s13, 4294967168 }
  0x4b   : > { %1049 = dma.done.wait (%p49_p1), [#allocation6], 512  }
  0x4c   : > { %1051 = vsyncadd (%p49_p1), [#allocation6], 4294966784 }
  0x4d   : > { %1053 = dma.done.wait (%p49_p1), [#allocation9], 1024  }
  0x4e   : > { %1055 = vsyncadd (%p49_p1), [#allocation9], 4294966272  ;;  %v787_v0 = vld [vmem:[#allocation7 + $0x18] sm:$0xff]  ;;  %v785_v1 = vld [vmem:[#allocation7 + $0x8] sm:$0xff]  ;;  %vm422_vm0 = vcmask 261120   ;;  %s781_s14 = sshll.u32 %s1149_s12, 3 }
  0x4f   : > { %v786_v2 = vld [vmem:[#allocation7 + $0x10] sm:$0xff]  ;;  %v784_v3 = vld [vmem:[#allocation7] sm:$0xff]  ;;  %432 = vmatpush.bf16.msra.mxu0 %v787_v0  ;;  %460 = vmatpush.bf16.msra.mxu1 %v785_v1  ;;  %v795_v6 = vld [vmem:[#allocation8 + $0x38] sm:$0xff]  ;;  %s598_s20 = scalar_lea.hbm %s1326_s8, %s781_s14  ;;  %s394_s12 = scalar_lea.vmem [#allocation10], %s1250_s9 }
  0x50   : > { %v400_v4 = vld [vmem:[%s346_s23] sm:$0xff]  ;;  %v398_v5 = vld [vmem:[%s336_s16] sm:$0xff]  ;;  %542 = vmatpush.bf16.msra.mxu2 %v795_v6  ;;  %s600_s24 = sshll.u32 %s394_s12, 4  ;;  %s602_s17 = sshll.u32 %s598_s20, 4  ;;  %s601_s24 = int_to_ptr.vmem [resolvable:$true] %s600_s24  ;;  %s603_s17 = int_to_ptr.hbm [resolvable:$true] %s602_s17 }
  0x51   : > { %v794_v7 = vld [vmem:[#allocation8 + $0x30] sm:$0xff]  ;;  %v401_v8 = vpack.c.bf16 %v400_v4, %v400_v4  ;;  %v399_v9 = vpack.c.bf16 %v398_v5, %v398_v5  ;;  %v793_v10 = vld [vmem:[#allocation8 + $0x28] sm:$0xff]  ;;  %v792_v11 = vld [vmem:[#allocation8 + $0x20] sm:$0xff]  ;;  %s588_s16 = scalar_lea.sflag [#allocation4], %s1247_s29  ;;  %s1010_s30 = sshra.s32 %s603_s17, 4  ;;  %s1011_s30 = int_to_ptr.hbm [resolvable:$true] %s1010_s30 }
  0x52   : > { %v791_v12 = vld [vmem:[#allocation8 + $0x18] sm:$0xff]  ;;  %v790_v13 = vld [vmem:[#allocation8 + $0x10] sm:$0xff]  ;;  %v789_v14 = vld [vmem:[#allocation8 + $0x8] sm:$0xff]  ;;  %s1012_s13 = scalar_lea.hbm %s1011_s30, 8  ;;  %s1016_s25 = scalar_lea.hbm %s1326_s8, 16 }
  0x53   : > { %433 = vmatpush.bf16.msra.mxu0 %v786_v2  ;;  %461 = vmatpush.bf16.msra.mxu1 %v784_v3  ;;  %v788_v15 = vld [vmem:[#allocation8] sm:$0xff]  ;;  %p1013_p1 = scmp.ne.s32.totalorder %s1011_s30, %s1012_s13  ;;  %p1017_p7 = scmp.lt.s32.totalorder %s1011_s30, %s1326_s8 }
  0x54   : > { %543 = vmatpush.bf16.msra.mxu2 %v794_v7  ;;  %v870_v16 = vld [vmem:[%s1321_s3] ss:$0 sm:$0xff]  ;;  %p1018_p9 = scmp.lt.s32.totalorder %s1016_s25, %s1012_s13 }
  0x55   : > { %v871_v25 = vld [vmem:[%s1323_s5] ss:$0 sm:$0xff]  ;;  %p1014_p3 = pnand %p1013_p1, %p1194_p4 }
  0x56   : > { %738 = vmatmul.msk.bf16.vlgmr.msra.gmra.mxu0 %vm422_vm0, %v401_v8  ;;  %747 = vmatmul.msk.bf16.vlgmr.msra.gmra.mxu1 %vm422_vm0, %v399_v9  ;;  %v872_v45 = vld [vmem:[%s1324_s6] ss:$0 sm:$0xff]  ;;  %p1019_p8 = por %p1018_p9, %p1017_p7 }
  0x57   : > { %v873_v48 = vld [vmem:[%s1325_s7] ss:$0 sm:$0xff]  ;;  %p1015_p12 = pneg %p1014_p3 }
  0x58   : > { %544 = vmatpush.bf16.msra.mxu2 %v793_v10 }
  0x59   : > { %p1020_p10 = pnand %p1019_p8, %p1015_p12 }
  0x5c   : > { %545 = vmatpush.bf16.msra.mxu2 %v792_v11 }
  0x60   : > { %546 = vmatpush.bf16.msra.mxu2 %v791_v12 }
  0x64   : > { %547 = vmatpush.bf16.msra.mxu2 %v790_v13 }
  0x68   : > { %548 = vmatpush.bf16.msra.mxu2 %v789_v14 }
  0x6c   : > { %549 = vmatpush.bf16.msra.mxu2 %v788_v15 }
  0xd3   : > { %v435_v17 = vpop.f32.mrf.mxu0  ;;  %v463_v18 = vpop.f32.mrf.mxu1 }
  0xd4   : > { %v464_v19 = vadd.f32 %v463_v18, %v435_v17 }
  0xd6   : > { %v471_v20 = vadd.f32 %v870_v16, %v464_v19 }
  0xd8   : > { %v472_v21 = vmax.f32 %v471_v20, 0.0 }
  0xda   : > { %v473_v22 = vpack.c.bf16 %v472_v21, %v472_v21 }
  0xdb   : > { %v437_v23 = vpop.f32.mrf.mxu0  ;;  %v465_v24 = vpop.f32.mrf.mxu1 }
  0xdc   : > { %550 = vmatmul.bf16.vlgmr.msra.gmra.mxu2 %v473_v22 }
 0x15f   : > { %v551_v26 = vpop.f32.mrf.mxu2 }
 0x160   : > { %v552_v27 = vadd.f32 %v871_v25, %v551_v26 }
 0x162   : > { %555 = vadd.xlane.f32.xlu0 %v552_v27  ;;  %v557_v29 = vmul.f32 %v552_v27, %v552_v27 }
 0x167   : > { %v553_v28 = vpop.f32.mrf.mxu2 }
 0x16a   : > { %558 = vadd.xlane.f32.xlu0 %v557_v29 }
 0x1d5   : > { %v556_v30 = vpop.xlane.xlu0 %555 }
 0x1d6   : > { %v560_v31 = vmul.f32 0.03125, %v556_v30 }
 0x1d8   : > { %v562_v33 = vmul.f32 %v560_v31, %v560_v31  ;;  %v565_v44 = vsub.f32 %v552_v27, %v560_v31 }
 0x1dd   : > { %v559_v32 = vpop.xlane.xlu0 %558 }
 0x1de   : > { %v561_v34 = vmul.f32 0.03125, %v559_v32 }
 0x1e0   : > { %v563_v35 = vsub.f32 %v561_v34, %v562_v33 }
 0x1e2   : > { %v564_v36 = vmax.f32 %v563_v35, 0.0 }
 0x1e4   : > { %v566_v37 = vadd.f32 1e-05, %v564_v36 }
 0x1e6   : > { %874 = vrsqrt.f32 %v566_v37  ;;  %vm573_vm2 = vweird.f32 %v566_v37 }
 0x1ec   : > { %v875_v38 = vpop.eup %874 }
 0x1ed   : > { %v568_v39 = vmul.f32 %v875_v38, %v566_v37  ;;  %vm574_vm1 = vweird.f32 %v875_v38 }
 0x1ee   : > { %vm575_vm3 = vmor %vm573_vm2, %vm574_vm1 }
 0x1ef   : > { %v569_v40 = vmul.f32 %v875_v38, %v568_v39 }
 0x1f1   : > { %v570_v41 = vmul.f32 0.5, %v569_v40 }
 0x1f3   : > { %v571_v42 = vsub.f32 1.5, %v570_v41 }
 0x1f5   : > { %v572_v43 = vmul.f32 %v875_v38, %v571_v42 }
 0x1f7   : > { %v576_v46 = vsel %vm575_vm3, %v875_v38, %v572_v43 }
 0x1f8   : > { %v577_v47 = vmul.f32 %v576_v46, %v565_v44 }
 0x1fa   : > { %v581_v49 = vmul.f32 %v872_v45, %v577_v47 }
 0x1fc   : > { %v585_v50 = vadd.f32 %v873_v48, %v581_v49 }
 0x1fe   : > { %586 = vst [vmem:[%s394_s12] sm:$0xff] %v585_v50 }
 0x1ff   : > { %1023 = shalt.err (!%p1020_p10)
}
 0x200   : > { %808 = dma.vmem_to_hbm [thread:$0]  (%p1194_p4), %s601_s24, 128, %s603_s17, %s588_s16  }
 0x201 PF: > { %s1348_s4 = sld [smem:[#allocation17_spill]]  ;;  %s614_s14 = sand.u32 1, %s1062_s27  }
 0x202   : > { %s615_s18 = scalar_lea.sflag [#allocation4], %s614_s14 }
 0x207   : > { %p1349_p11 = scmp.ge.s32.totalorder %s1348_s4, 2 }
 0x209   : > { %p825_p5 = pnand %p1349_p11, %p1198_p6 }
 0x20b   : > { %p826_p13 = pneg %p825_p5 }
 0x20d   : > { %1057 = dma.done.wait (%p826_p13), %s615_s18, 128  }
 0x20e   : > { %1059 = vsyncadd (%p826_p13), %s615_s18, 4294967168  ;;  %s1350_s30 = sld [smem:[#allocation18_spill]]  ;;  %s1353_s27 = smov %s1066_s28 }
 0x20f   : > { %s1351_s10 = sld [smem:[#allocation16_spill]] }
 0x210   : > { %s1352_s29 = sld [smem:[#allocation19_spill]] }
 0x214   : > { %p25_p0 = scmp.ge.s32.totalorder %s1350_s30, 4  }
 0x215   : > { %s1354_s28 = smov %s1351_s10 }
 0x216   :  { %27 = sbr.rel (!%p25_p0) target bundleno = 11 (0xb), region = 118 }
 0x21b   :  { %621 = vsyncpa [#allocation3], 1 }
 0x21c   :  { %623 = vsyncpa [#allocation3 + $0x1], 1 }
 0x21d   :  { %624 = vsyncpa [#allocation6], 1 }
 0x21e   :  { %626 = vsyncpa [#allocation6 + $0x1], 1 }
 0x21f   :  { %627 = vsyncpa [#allocation9], 1 }
 0x220   :  { %628 = vsyncpa [#allocation4], 1 }
 0x221   :  { %630 = vsyncpa [#allocation4 + $0x1], 1 }

</bundles_post_ra>
